<compile_context>
chip_gen: v7x
topology: tpu7x:2x2x1
jax: 0.10.0
libtpu: 0.0.40
codegen_flags: <defaults>
</compile_context>

<pallas_src>
import jax
import jax.numpy as jnp
from jax.experimental import pallas as pl
from jax.experimental.pallas import tpu as pltpu


def _upsample_conv_kernel(xw_ref, vw_ref, a2_ref, b_ref, o_ref, rhs_ref):
    """Whole batch in one program; fused 2x-upsample + 'same' conv, 2 MXU jobs.

    xw_ref:  (B*H, CWp)        activations, lane-dense, contraction zero-padded
    vw_ref:  (CWp, K*N)        weights w/ col upsample+pad+taps and Cin folded
    a2_ref:  (B*Hout, K*B*H)   0/1 row-select + row-tap-sum (batch block-diag)
    b_ref:   (1, N)            bias replicated over Wout (f32)
    o_ref:   (B*Hout, N)       lane-dense output slab, N = Wout*Cout
    rhs_ref: (K*B*H, N)        VMEM scratch: per-tap partial convs, row-stacked
    """
    bh = xw_ref.shape[0]
    n = o_ref.shape[-1]
    k = vw_ref.shape[-1] // n

    # Stage 1 (one MXU job): contract Cin and all K column taps for every
    # source row at once.  Q[h', r*N + q*Cout + co] = partial conv of source
    # row h' against weight row-tap r.
    q = jnp.dot(xw_ref[...], vw_ref[...], preferred_element_type=jnp.float32)

    # Re-stack the K lane-blocks of Q onto the contraction (sublane) axis.
    # Static slices, 256-lane / 32-sublane aligned -> unmasked vld/vst only.
    for r in range(k):
        rhs_ref[pl.ds(r * bh, bh), :] = (
            q[:, r * n:(r + 1) * n].astype(rhs_ref.dtype))

    # Stage 2 (one MXU job): A2 performs nearest-2x row upsample + zero pad +
    # row-tap selection AND the sum over row taps for both images at once.
    out = jnp.dot(a2_ref[...], rhs_ref[...], preferred_element_type=jnp.float32)
    o_ref[...] = (out + b_ref[...]).astype(o_ref.dtype)


def upsample_conv_forward(x_nchw, w_oihw, bias, kernel_size):
    """UpSampleConv.forward: cat x4 + DepthToSpace(2) + 'same' conv + bias."""
    B, Cin, H, W = x_nchw.shape
    Cout = w_oihw.shape[0]
    K = kernel_size
    pad = (K - 1) // 2
    Hup, Wup = 2 * H, 2 * W                              # nearest-neighbor 2x
    Hout = Hup + 2 * pad - K + 1
    Wout = Wup + 2 * pad - K + 1
    CW = Cin * W
    CWp = ((CW + 127) // 128) * 128                      # lane-dense contraction
    N = Wout * Cout

    f32, bf16 = jnp.float32, jnp.bfloat16
    x = x_nchw.astype(f32)
    wt = w_oihw.astype(f32)
    b = bias.astype(f32)

    # ---- wrapper-side layout plumbing + weight-only preprocessing (tiny) ----
    # Lane-dense activation repack: (B,Cin,H,W) -> (B*H, Cin*W), zero-padded on
    # the contraction axis to 128 lanes. bf16 halves HBM traffic and hits the
    # bf16-native MXU; accumulation stays f32.
    x_rows = jnp.transpose(x, (0, 2, 1, 3)).reshape(B * H, CW)
    x_rows = jnp.pad(x_rows, ((0, 0), (0, CWp - CW))).astype(bf16)

    # A[r,i,h] = 1 iff padded-upsampled row (i+r-pad) is in range and its
    # nearest source row is h = (i+r-pad)//2  (upsample + pad + row tap fused).
    r_idx = jnp.arange(K)[:, None, None]
    i_idx = jnp.arange(Hout)[None, :, None]
    h_idx = jnp.arange(H)[None, None, :]
    src_r = i_idx + r_idx - pad
    valid_r = (src_r >= 0) & (src_r < Hup)   # mask guards negative floor-div
    A = (valid_r & (h_idx == jnp.clip(src_r, 0, Hup - 1) // 2)).astype(f32)

    # Batch block-diagonal so the whole batch folds into the M dimension of
    # one matmul: A2[b*Hout+i, r*(B*H) + b*H + h] = A[r,i,h].
    A2 = jnp.einsum('rih,bc->birch', A, jnp.eye(B, dtype=f32))
    A2 = A2.reshape(B * Hout, K * B * H).astype(bf16)    # 0/1 -> exact in bf16

    # Bsel[s,w,q] = 1 iff padded-upsampled col (q+s-pad) is in range and its
    # nearest source col is w = (q+s-pad)//2.
    s_idx = jnp.arange(K)[:, None, None]
    w_idx = jnp.arange(W)[None, :, None]
    q_idx = jnp.arange(Wout)[None, None, :]
    src_c = q_idx + s_idx - pad
    valid_c = (src_c >= 0) & (src_c < Wup)
    Bsel = (valid_c & (w_idx == jnp.clip(src_c, 0, Wup - 1) // 2)).astype(f32)

    # V[r, ci*W+w, q*Cout+co] = sum_s wt[co,ci,r,s] * Bsel[s,w,q], laid out as
    # V_wide[c, r*N+n] so ALL K column-tap partials come out of one matmul.
    V = jnp.einsum('oirs,swq->riwqo', wt, Bsel).reshape(K, CW, N)
    V_wide = jnp.transpose(V, (1, 0, 2)).reshape(CW, K * N)
    V_wide = jnp.pad(V_wide, ((0, CWp - CW), (0, 0))).astype(bf16)
    # TODO(synk): at production sizes V_wide scales as Cin*W*Wout*Cout; add a
    # grid axis tiling N (output tiles), pl.Buffered(1) for the then-resident
    # constant operands, and an explicit vmem_limit_bytes.

    bias_wide = jnp.tile(b, Wout).reshape(1, N)

    flops = 2 * (B * H * CWp * K * N + (B * Hout) * (K * B * H) * N)
    bytes_accessed = (2 * (x_rows.size + V_wide.size + A2.size)
                      + 4 * (bias_wide.size + B * Hout * N))

    out_flat = pl.pallas_call(
        _upsample_conv_kernel,
        out_shape=jax.ShapeDtypeStruct((B * Hout, N), f32),
        grid=(1,),   # this size is fixed-overhead-bound: whole batch, one step
        in_specs=[
            pl.BlockSpec((B * H, CWp), lambda i: (0, 0)),
            pl.BlockSpec((CWp, K * N), lambda i: (0, 0)),
            pl.BlockSpec((B * Hout, K * B * H), lambda i: (0, 0)),
            pl.BlockSpec((1, N), lambda i: (0, 0)),
        ],
        out_specs=pl.BlockSpec((B * Hout, N), lambda i: (0, 0)),
        scratch_shapes=[pltpu.VMEM((K * B * H, N), bf16)],
        compiler_params=pltpu.CompilerParams(
            dimension_semantics=("arbitrary",)),
        cost_estimate=pl.CostEstimate(flops=int(flops), transcendentals=0,
                                      bytes_accessed=int(bytes_accessed)),
    )(x_rows, V_wide, A2, bias_wide)

    # Pure layout plumbing back to PyTorch's NCHW.
    out = out_flat.reshape(B, Hout, Wout, Cout).transpose(0, 3, 1, 2)
    return out.astype(x_nchw.dtype)


if __name__ == "__main__":
    # UpSampleConv(input_dim=4, output_dim=8, kernel_size=3, bias=True)
    input_dim, output_dim, kernel_size = 4, 8, 3
    B, H, W = 2, 16, 16

    key = jax.random.PRNGKey(0)
    kx, kw, kb = jax.random.split(key, 3)

    x = jax.random.normal(kx, (B, input_dim, H, W), dtype=jnp.float32)
    fan_in = input_dim * kernel_size * kernel_size
    w = jax.random.normal(
        kw, (output_dim, input_dim, kernel_size, kernel_size),
        dtype=jnp.float32) * (1.0 / jnp.sqrt(fan_in))
    b = jax.random.normal(kb, (output_dim,), dtype=jnp.float32) * 0.01

    out = upsample_conv_forward(x, w, b, kernel_size)
    out = jax.block_until_ready(out)
    assert out.shape == (B, output_dim, 2 * H, 2 * W), out.shape

    # Correctness check against a pure-JAX f32 reference of the same math:
    # cat x4 + DepthToSpace(2) == nearest-neighbor 2x, then "same" conv + bias.
    # Tolerance relaxed vs. the f32 kernel because matmul operands are bf16
    # (accumulation is f32).
    up_ref = jnp.repeat(jnp.repeat(x, 2, axis=2), 2, axis=3)
    pad = (kernel_size - 1) // 2
    ref = jax.lax.conv_general_dilated(
        up_ref, w, window_strides=(1, 1),
        padding=((pad, pad), (pad, pad)),
        dimension_numbers=("NCHW", "OIHW", "NCHW"),
    ) + b[None, :, None, None]
    assert jnp.allclose(out, ref, atol=5e-2, rtol=5e-2), \
        float(jnp.max(jnp.abs(out - ref)))

    print("KERNEL_OK")
</pallas_src>

<mosaic_0001>
module attributes {stable_mosaic.version = 11 : i64} {
  func.func @_upsample_conv_kernel(%arg0: i32, %arg1: memref<32x128xbf16, #tpu.memory_space<vmem>>, %arg2: memref<128x768xbf16, #tpu.memory_space<vmem>>, %arg3: memref<64x96xbf16, #tpu.memory_space<vmem>>, %arg4: memref<1x256xf32, #tpu.memory_space<vmem>>, %arg5: memref<64x256xf32, #tpu.memory_space<vmem>>, %arg6: memref<96x256xbf16, #tpu.memory_space<vmem>>) attributes {dimension_semantics = [#tpu.dimension_semantics<arbitrary>], iteration_bounds = array<i64: 1>, scalar_prefetch = 0 : i64, scratch_operands = 1 : i64, tpu.core_type = #tpu.core_type<tc>, window_params = [{pipeline_mode = #tpu.pipeline_mode<synchronous>, transform_indices = @transform_0, window_bounds = array<i64: 32, 128>}, {pipeline_mode = #tpu.pipeline_mode<synchronous>, transform_indices = @transform_1, window_bounds = array<i64: 128, 768>}, {pipeline_mode = #tpu.pipeline_mode<synchronous>, transform_indices = @transform_2, window_bounds = array<i64: 64, 96>}, {pipeline_mode = #tpu.pipeline_mode<synchronous>, transform_indices = @transform_3, window_bounds = array<i64: 1, 256>}, {pipeline_mode = #tpu.pipeline_mode<synchronous>, transform_indices = @transform_4, window_bounds = array<i64: 64, 256>}]} {
    %c0 = arith.constant 0 : index
    %c0_0 = arith.constant 0 : index
    %0 = vector.load %arg1[%c0, %c0_0] : memref<32x128xbf16, #tpu.memory_space<vmem>>, vector<32x128xbf16>
    %c0_1 = arith.constant 0 : index
    %c0_2 = arith.constant 0 : index
    %1 = vector.load %arg2[%c0_1, %c0_2] : memref<128x768xbf16, #tpu.memory_space<vmem>>, vector<128x768xbf16>
    %cst = arith.constant dense<0.000000e+00> : vector<32x768xf32>
    %2 = tpu.matmul %0, %1, %cst {dimension_numbers = #tpu.dot_dimension_numbers<[1], [0], [0], [1], [0, 0, 1, 1], [], []>} : vector<32x128xbf16>, vector<128x768xbf16>, vector<32x768xf32> -> vector<32x768xf32>
    %3 = vector.extract_strided_slice %2 {offsets = [0, 0], sizes = [32, 256], strides = [1, 1]} : vector<32x768xf32> to vector<32x256xf32>
    %4 = arith.truncf %3 : vector<32x256xf32> to vector<32x256xbf16>
    %c0_3 = arith.constant 0 : index
    %c0_4 = arith.constant 0 : index
    %5 = vector.load %arg6[%c0_3, %c0_4] : memref<96x256xbf16, #tpu.memory_space<vmem>>, vector<32x256xbf16>
    tpu.vector_store %arg6[%c0_3, %c0_4], %4 {strides = array<i32>} : memref<96x256xbf16, #tpu.memory_space<vmem>>, vector<32x256xbf16>,
    %6 = vector.extract_strided_slice %2 {offsets = [0, 256], sizes = [32, 256], strides = [1, 1]} : vector<32x768xf32> to vector<32x256xf32>
    %7 = arith.truncf %6 : vector<32x256xf32> to vector<32x256xbf16>
    %c32 = arith.constant 32 : index
    %c0_5 = arith.constant 0 : index
    %8 = vector.load %arg6[%c32, %c0_5] : memref<96x256xbf16, #tpu.memory_space<vmem>>, vector<32x256xbf16>
    tpu.vector_store %arg6[%c32, %c0_5], %7 {strides = array<i32>} : memref<96x256xbf16, #tpu.memory_space<vmem>>, vector<32x256xbf16>,
    %9 = vector.extract_strided_slice %2 {offsets = [0, 512], sizes = [32, 256], strides = [1, 1]} : vector<32x768xf32> to vector<32x256xf32>
    %10 = arith.truncf %9 : vector<32x256xf32> to vector<32x256xbf16>
    %c64 = arith.constant 64 : index
    %c0_6 = arith.constant 0 : index
    %11 = vector.load %arg6[%c64, %c0_6] : memref<96x256xbf16, #tpu.memory_space<vmem>>, vector<32x256xbf16>
    tpu.vector_store %arg6[%c64, %c0_6], %10 {strides = array<i32>} : memref<96x256xbf16, #tpu.memory_space<vmem>>, vector<32x256xbf16>,
    %c0_7 = arith.constant 0 : index
    %c0_8 = arith.constant 0 : index
    %12 = vector.load %arg3[%c0_7, %c0_8] : memref<64x96xbf16, #tpu.memory_space<vmem>>, vector<64x96xbf16>
    %c0_9 = arith.constant 0 : index
    %c0_10 = arith.constant 0 : index
    %13 = vector.load %arg6[%c0_9, %c0_10] : memref<96x256xbf16, #tpu.memory_space<vmem>>, vector<96x256xbf16>
    %cst_11 = arith.constant dense<0.000000e+00> : vector<64x256xf32>
    %14 = tpu.matmul %12, %13, %cst_11 {dimension_numbers = #tpu.dot_dimension_numbers<[1], [0], [0], [1], [0, 0, 1, 1], [], []>} : vector<64x96xbf16>, vector<96x256xbf16>, vector<64x256xf32> -> vector<64x256xf32>
    %c0_12 = arith.constant 0 : index
    %c0_13 = arith.constant 0 : index
    %15 = vector.load %arg4[%c0_12, %c0_13] : memref<1x256xf32, #tpu.memory_space<vmem>>, vector<1x256xf32>
    %16 = vector.broadcast %15 : vector<1x256xf32> to vector<64x256xf32>
    %17 = arith.addf %14, %16 : vector<64x256xf32>
    %c0_14 = arith.constant 0 : index
    %c0_15 = arith.constant 0 : index
    %18 = vector.load %arg5[%c0_14, %c0_15] : memref<64x256xf32, #tpu.memory_space<vmem>>, vector<64x256xf32>
    tpu.vector_store %arg5[%c0_14, %c0_15], %17 {strides = array<i32>} : memref<64x256xf32, #tpu.memory_space<vmem>>, vector<64x256xf32>,
    return
  }
  func.func @transform_0(%arg0: i32) -> (i32, i32) {
    %c0_i32 = arith.constant 0 : i32
    %c0_i32_0 = arith.constant 0 : i32
    %c0_i32_1 = arith.constant 0 : i32
    return %c0_i32, %c0_i32_0 : i32, i32
  }
  func.func @transform_1(%arg0: i32) -> (i32, i32) {
    %c0_i32 = arith.constant 0 : i32
    %c0_i32_0 = arith.constant 0 : i32
    %c0_i32_1 = arith.constant 0 : i32
    return %c0_i32, %c0_i32_0 : i32, i32
  }
  func.func @transform_2(%arg0: i32) -> (i32, i32) {
    %c0_i32 = arith.constant 0 : i32
    %c0_i32_0 = arith.constant 0 : i32
    %c0_i32_1 = arith.constant 0 : i32
    return %c0_i32, %c0_i32_0 : i32, i32
  }
  func.func @transform_3(%arg0: i32) -> (i32, i32) {
    %c0_i32 = arith.constant 0 : i32
    %c0_i32_0 = arith.constant 0 : i32
    %c0_i32_1 = arith.constant 0 : i32
    return %c0_i32, %c0_i32_0 : i32, i32
  }
  func.func @transform_4(%arg0: i32) -> (i32, i32) {
    %c0_i32 = arith.constant 0 : i32
    %c0_i32_0 = arith.constant 0 : i32
    %c0_i32_1 = arith.constant 0 : i32
    return %c0_i32, %c0_i32_0 : i32, i32
  }
}

</mosaic_0001>

<bundles_post_ra>
// kernel: tpu_custom_call.1
= control target key start
LH: loop header
LB: loop body
LE: loop exit
PB: predicated region body
PF: predicated region fallthrough
CT: control target
= control target key end

     0   :  { %9 = vsyncpa [#allocation4], 0  ;;  %s1057_s0 = inlined_call_operand.hbm [shape: bf16[32,128], index: 0, kind: input, shape index: {}]   ;;  %s1058_s1 = inlined_call_operand.hbm [shape: bf16[128,768], index: 1, kind: input, shape index: {}]   ;;  %s1059_s2 = inlined_call_operand.hbm [shape: bf16[64,96], index: 2, kind: input, shape index: {}]   ;;  %s1060_s3 = inlined_call_operand.vmem [shape: f32[1,256], index: 3, kind: input, shape index: {}]   ;;  %s1061_s4 = inlined_call_operand.hbm [shape: f32[64,256], index: 4, kind: output, shape index: {}]  }
   0x1   :  { %10 = vsyncpa [#allocation7], 0 }
   0x2   :  { %11 = vsyncpa [#allocation5], 0  ;;  %s960_s15 = smov [#allocation6]   ;;  %s866_s19 = scalar_lea.hbm %s1058_s1, 6144 }
   0x3   :  { %s29_s16 = sshll.u32 %s960_s15, 4  ;;  %p867_p0 = scmp.ne.s32.totalorder %s1058_s1, %s866_s19  ;;  %s30_s16 = int_to_ptr.vmem [resolvable:$true] %s29_s16 }
   0x4   :  { %p870_p1 = scmp.lt.u32.totalorder %s866_s19, %s1058_s1 }
   0x6   :  { %p872_p2 = pnand %p870_p1, %p867_p0 }
   0x8   :  { %875 = shalt.err (!%p872_p2)
}
   0x9   :  { %s876_s24 = scalar_lea.vmem %s30_s16, 6144  ;;  %p881_p4 = scmp.lt.s32.totalorder %s30_s16, %s30_s16 }
   0xa   :  { %p877_p3 = scmp.ne.s32.totalorder %s30_s16, %s876_s24  ;;  %p882_p5 = scmp.lt.s32.totalorder %s876_s24, %s876_s24 }
   0xc   :  { %p883_p6 = por %p882_p5, %p881_p4 }
   0xe   :  { %p884_p7 = pnand %p883_p6, %p877_p3 }
  0x10   :  { %887 = shalt.err (!%p884_p7)
}
  0x11   :  { %s961_s25 = smov 384   ;;  %s962_s26 = smov 24  }
  0x12   :  { %35 = dma.hbm_to_vmem [thread:$0]  %s1058_s1, 6144, %s30_s16, [#allocation7], %s961_s25, %s961_s25, %s962_s26  }
  0x13   :  { %s963_s29 = smov [#allocation3]   ;;  %s888_s7 = scalar_lea.hbm %s1057_s0, 256 }
  0x14   :  { %s17_s30 = sshll.u32 %s963_s29, 4  ;;  %p889_p8 = scmp.ne.s32.totalorder %s1057_s0, %s888_s7  ;;  %s18_s30 = int_to_ptr.vmem [resolvable:$true] %s17_s30 }
  0x15   :  { %p892_p9 = scmp.lt.u32.totalorder %s888_s7, %s1057_s0 }
  0x17   :  { %p894_p10 = pnand %p892_p9, %p889_p8 }
  0x19   :  { %897 = shalt.err (!%p894_p10)
}
  0x1a   :  { %s898_s12 = scalar_lea.vmem %s18_s30, 256  ;;  %p903_p12 = scmp.lt.s32.totalorder %s18_s30, %s18_s30 }
  0x1b   :  { %p899_p11 = scmp.ne.s32.totalorder %s18_s30, %s898_s12  ;;  %p904_p13 = scmp.lt.s32.totalorder %s898_s12, %s898_s12 }
  0x1d   :  { %p905_p0 = por %p904_p13, %p903_p12 }
  0x1f   :  { %p906_p1 = pnand %p905_p0, %p899_p11 }
  0x21   :  { %909 = shalt.err (!%p906_p1)
}
  0x22   :  { %s964_s1 = smov 64   ;;  %s965_s13 = smov 4  }
  0x23   :  { %23 = dma.hbm_to_vmem [thread:$0]  %s1057_s0, 256, %s18_s30, [#allocation4], %s964_s1, %s964_s1, %s965_s13  }
  0x24   :  { %s966_s16 = smov [#allocation8]   ;;  %s910_s20 = scalar_lea.hbm %s1059_s2, 512 }
  0x25   :  { %s41_s17 = sshll.u32 %s966_s16, 4  ;;  %p911_p2 = scmp.ne.s32.totalorder %s1059_s2, %s910_s20  ;;  %s42_s17 = int_to_ptr.vmem [resolvable:$true] %s41_s17 }
  0x26   :  { %p914_p3 = scmp.lt.u32.totalorder %s910_s20, %s1059_s2 }
  0x28   :  { %p916_p4 = pnand %p914_p3, %p911_p2 }
  0x2a   :  { %919 = shalt.err (!%p916_p4)
}
  0x2b   :  { %s920_s25 = scalar_lea.vmem %s42_s17, 512  ;;  %p925_p6 = scmp.lt.s32.totalorder %s42_s17, %s42_s17 }
  0x2c   :  { %p921_p5 = scmp.ne.s32.totalorder %s42_s17, %s920_s25  ;;  %p926_p7 = scmp.lt.s32.totalorder %s920_s25, %s920_s25 }
  0x2e   :  { %p927_p8 = por %p926_p7, %p925_p6 }
  0x30   :  { %p928_p9 = pnand %p927_p8, %p921_p5 }
  0x32   :  { %931 = shalt.err (!%p928_p9)
}
  0x33   :  { %47 = dma.hbm_to_vmem [thread:$0]  %s1059_s2, 512, %s42_s17, [#allocation7], %s964_s1, %s964_s1, %s965_s13  }
  0x34   :  { %954 = dma.done.wait [#allocation4], 256  }
  0x35   :  { %955 = vsyncadd [#allocation4], 4294967040 }
  0x36   :  { %956 = dma.done.wait [#allocation7], 6656  }
  0x37   :  { %957 = vsyncadd [#allocation7], 4294960640  ;;  %v967_v0 = vmov 0   ;;  %v788_v1 = vld [vmem:[#allocation6 + $0x4] ss:$24 sps:$4 sm:$0xff]   ;;  %v821_v31 = vld [vmem:[#allocation3] sm:$0xff]  }
  0x38   :  { %396 = vmatprep.mubr.bf16.mxu0 %v967_v0  ;;  %449 = vmatprep.mubr.bf16.mxu1 %v967_v0  ;;  %v790_v2 = vld [vmem:[#allocation6] ss:$24 sps:$4 sm:$0xff]   ;;  %v791_v3 = vld [vmem:[#allocation6 + $0x34] ss:$24 sps:$4 sm:$0xff]   ;;  %v793_v4 = vld [vmem:[#allocation6 + $0x30] ss:$24 sps:$4 sm:$0xff]  }
  0x39   :  { %364 = vmatprep.subr.bf16.mxu0 %v788_v1  ;;  %v794_v5 = vld [vmem:[#allocation6 + $0x64] ss:$24 sps:$4 sm:$0xff]   ;;  %v796_v6 = vld [vmem:[#allocation6 + $0x60] ss:$24 sps:$4 sm:$0xff]   ;;  %v797_v7 = vld [vmem:[#allocation6 + $0x94] ss:$24 sps:$4 sm:$0xff]  }
  0x3a   :  { %365 = vmatpush1.bf16.msra.mxu0 %v790_v2  ;;  %v805_v8 = vld [vmem:[#allocation6 + $0xc] ss:$24 sps:$4 sm:$0xff]   ;;  %v808_v9 = vld [vmem:[#allocation6 + $0x8] ss:$24 sps:$4 sm:$0xff]   ;;  %v811_v11 = vld [vmem:[#allocation6 + $0x3c] ss:$24 sps:$4 sm:$0xff]  }
  0x3b   :  { %366 = vmatprep.subr.bf16.mxu0 %v791_v3  ;;  %417 = vmatprep.subr.bf16.mxu1 %v805_v8  ;;  %v799_v10 = vld [vmem:[#allocation6 + $0x90] ss:$24 sps:$4 sm:$0xff]   ;;  %v800_v13 = vld [vmem:[#allocation6 + $0xc4] ss:$24 sps:$4 sm:$0xff]   ;;  %v802_v15 = vld [vmem:[#allocation6 + $0xc0] ss:$24 sps:$4 sm:$0xff]  }
  0x3c   :  { %418 = vmatpush1.bf16.msra.mxu1 %v808_v9  ;;  %v814_v12 = vld [vmem:[#allocation6 + $0x38] ss:$24 sps:$4 sm:$0xff]   ;;  %v817_v14 = vld [vmem:[#allocation6 + $0x6c] ss:$24 sps:$4 sm:$0xff]   ;;  %v820_v17 = vld [vmem:[#allocation6 + $0x68] ss:$24 sps:$4 sm:$0xff]  }
  0x3d   :  { %419 = vmatprep.subr.bf16.mxu1 %v811_v11  ;;  %v803_v16 = vld [vmem:[#allocation6 + $0xf4] ss:$24 sps:$4 sm:$0xff]   ;;  %v807_v19 = vld [vmem:[#allocation6 + $0xf0] ss:$24 sps:$4 sm:$0xff]   ;;  %v809_v21 = vld [vmem:[#allocation6 + $0x124] ss:$24 sps:$4 sm:$0xff]  }
  0x3e   :  { %367 = vmatpush1.bf16.msra.mxu0 %v793_v4  ;;  %v822_v18 = vld [vmem:[#allocation6 + $0x9c] ss:$24 sps:$4 sm:$0xff]   ;;  %v827_v20 = vld [vmem:[#allocation6 + $0x98] ss:$24 sps:$4 sm:$0xff]   ;;  %v828_v22 = vld [vmem:[#allocation6 + $0xcc] ss:$24 sps:$4 sm:$0xff]  }
  0x3f   :  { %368 = vmatprep.subr.bf16.mxu0 %v794_v5  ;;  %v813_v23 = vld [vmem:[#allocation6 + $0x120] ss:$24 sps:$4 sm:$0xff]   ;;  %v815_v24 = vld [vmem:[#allocation6 + $0x154] ss:$24 sps:$4 sm:$0xff]   ;;  %v819_v27 = vld [vmem:[#allocation6 + $0x150] ss:$24 sps:$4 sm:$0xff]  }
  0x40   :  { %420 = vmatpush1.bf16.msra.mxu1 %v814_v12  ;;  %v833_v25 = vld [vmem:[#allocation6 + $0xc8] ss:$24 sps:$4 sm:$0xff]   ;;  %v834_v26 = vld [vmem:[#allocation6 + $0xfc] ss:$24 sps:$4 sm:$0xff]   ;;  %v839_v29 = vld [vmem:[#allocation6 + $0xf8] ss:$24 sps:$4 sm:$0xff]  }
  0x41   :  { %421 = vmatprep.subr.bf16.mxu1 %v817_v14  ;;  %v826_v28 = vld [vmem:[#allocation6 + $0x14] ss:$24 sps:$4 sm:$0xff]   ;;  %v824_v32 = vld [vmem:[#allocation6 + $0x10] ss:$24 sps:$4 sm:$0xff]   ;;  %v832_v34 = vld [vmem:[#allocation6 + $0x44] ss:$24 sps:$4 sm:$0xff]  }
  0x42   :  { %369 = vmatpush1.bf16.msra.mxu0 %v796_v6  ;;  %v840_v30 = vld [vmem:[#allocation6 + $0x12c] ss:$24 sps:$4 sm:$0xff]   ;;  %v845_v33 = vld [vmem:[#allocation6 + $0x128] ss:$24 sps:$4 sm:$0xff]   ;;  %v847_v36 = vld [vmem:[#allocation6 + $0x15c] ss:$24 sps:$4 sm:$0xff]  }
  0x43   :  { %370 = vmatprep.subr.bf16.mxu0 %v797_v7  ;;  %v830_v35 = vld [vmem:[#allocation6 + $0x40] ss:$24 sps:$4 sm:$0xff]   ;;  %v838_v38 = vld [vmem:[#allocation6 + $0x74] ss:$24 sps:$4 sm:$0xff]   ;;  %v836_v40 = vld [vmem:[#allocation6 + $0x70] ss:$24 sps:$4 sm:$0xff]  }
  0x44   :  { %422 = vmatpush1.bf16.msra.mxu1 %v820_v17  ;;  %v852_v37 = vld [vmem:[#allocation6 + $0x158] ss:$24 sps:$4 sm:$0xff]   ;;  %v844_v41 = vld [vmem:[#allocation6 + $0xa4] ss:$24 sps:$4 sm:$0xff]   ;;  %v851_v43 = vld [vmem:[#allocation6 + $0xd4] ss:$24 sps:$4 sm:$0xff]  }
  0x45   :  { %423 = vmatprep.subr.bf16.mxu1 %v822_v18  ;;  %v846_v39 = vld [vmem:[#allocation3 + $0x8] sm:$0xff]   ;;  %v849_v44 = vld [vmem:[#allocation6 + $0xd0] ss:$24 sps:$4 sm:$0xff]   ;;  %v858_v47 = vld [vmem:[#allocation6 + $0x134] ss:$24 sps:$4 sm:$0xff]   ;;  %vm599_vm0 = vcmask 785408  }
  0x46   :  { %371 = vmatpush1.bf16.msra.mxu0 %v799_v10  ;;  %v842_v42 = vld [vmem:[#allocation6 + $0xa0] ss:$24 sps:$4 sm:$0xff]   ;;  %v855_v45 = vld [vmem:[#allocation6 + $0x104] ss:$24 sps:$4 sm:$0xff]   ;;  %v856_v48 = vld [vmem:[#allocation6 + $0x130] ss:$24 sps:$4 sm:$0xff]  }
  0x47   :  { %372 = vmatprep.subr.bf16.mxu0 %v800_v13  ;;  %v853_v46 = vld [vmem:[#allocation6 + $0x100] ss:$24 sps:$4 sm:$0xff]   ;;  %v861_v49 = vld [vmem:[#allocation6 + $0x164] ss:$24 sps:$4 sm:$0xff]  }
  0x48   :  { %424 = vmatpush1.bf16.msra.mxu1 %v827_v20  ;;  %v859_v50 = vld [vmem:[#allocation6 + $0x160] ss:$24 sps:$4 sm:$0xff]  }
  0x49   :  { %425 = vmatprep.subr.bf16.mxu1 %v828_v22 }
  0x4a   :  { %373 = vmatpush1.bf16.msra.mxu0 %v802_v15 }
  0x4b   :  { %374 = vmatprep.subr.bf16.mxu0 %v803_v16 }
  0x4c   :  { %426 = vmatpush1.bf16.msra.mxu1 %v833_v25  ;;  %v863_v25 = vld [vmem:[#allocation8 + $0x8] sm:$0xff]  }
  0x4d   :  { %427 = vmatprep.subr.bf16.mxu1 %v834_v26  ;;  %v864_v26 = vld [vmem:[#allocation8 + $0x10] sm:$0xff]  }
  0x4e   :  { %375 = vmatpush1.bf16.msra.mxu0 %v807_v19 }
  0x4f   :  { %376 = vmatprep.subr.bf16.mxu0 %v809_v21 }
  0x50   :  { %428 = vmatpush1.bf16.msra.mxu1 %v839_v29 }
  0x51   :  { %429 = vmatprep.subr.bf16.mxu1 %v840_v30 }
  0x52   :  { %377 = vmatpush1.bf16.msra.mxu0 %v813_v23 }
  0x53   :  { %378 = vmatprep.subr.bf16.mxu0 %v815_v24  ;;  %v862_v24 = vld [vmem:[#allocation8] sm:$0xff]  }
  0x54   :  { %430 = vmatpush1.bf16.msra.mxu1 %v845_v33 }
  0x55   :  { %431 = vmatprep.subr.bf16.mxu1 %v847_v36 }
  0x56   :  { %379 = vmatpush1.bf16.msra.mxu0 %v819_v27  ;;  %v865_v27 = vld [vmem:[#allocation8 + $0x18] sm:$0xff]  }
  0x57   :  { %470 = vmatprep.subr.bf16.mxu0 %v826_v28  ;;  %v569_v28 = vlaneseq }
  0x58   :  { %432 = vmatpush1.bf16.msra.mxu1 %v852_v37 }
  0x59   :  { %397 = vmatmul.mubr.bf16.vlgmr.msra.gmra.mrb[0].mxu0 %v821_v31  ;;  %v570_v29 = vshrl.u32 %v569_v28, 7 }
  0x5a   :  { %471 = vmatpush1.bf16.msra.mxu0 %v824_v32  ;;  %406 = vmatprep.mubr.bf16.mxu0 %v967_v0 }
  0x5b   :  { %472 = vmatprep.subr.bf16.mxu0 %v832_v34  ;;  %450 = vmatmul.mubr.bf16.vlgmr.msra.gmra.mrb[0].mxu1 %v821_v31  ;;  %v571_v30 = vsub.s32 0, %v570_v29  ;;  %v575_v32 = vsub.s32 1, %v570_v29 }
  0x5c   :  { %459 = vmatprep.mubr.bf16.mxu1 %v967_v0 }
  0x5e   :  { %473 = vmatpush1.bf16.msra.mxu0 %v830_v35 }
  0x5f   :  { %474 = vmatprep.subr.bf16.mxu0 %v838_v38 }
  0x61   :  { %407 = vmatmul.mubr.bf16.gmra.mrb[4].mxu0 %v846_v39 }
  0x62   :  { %475 = vmatpush1.bf16.msra.mxu0 %v836_v40  ;;  %502 = vmatprep.mubr.bf16.mxu0 %v967_v0 }
  0x63   :  { %476 = vmatprep.subr.bf16.mxu0 %v844_v41  ;;  %460 = vmatmul.mubr.bf16.gmra.mrb[4].mxu1 %v846_v39 }
  0x64   :  { %644 = vmatprep.mubr.bf16.mxu1 %v967_v0 }
  0x66   :  { %477 = vmatpush1.bf16.msra.mxu0 %v842_v42 }
  0x67   :  { %478 = vmatprep.subr.bf16.mxu0 %v851_v43 }
  0x6a   :  { %479 = vmatpush1.bf16.msra.mxu0 %v849_v44 }
  0x6b   :  { %480 = vmatprep.subr.bf16.mxu0 %v855_v45 }
  0x6e   :  { %481 = vmatpush1.bf16.msra.mxu0 %v853_v46 }
  0x6f   :  { %482 = vmatprep.subr.bf16.mxu0 %v858_v47 }
  0x72   :  { %483 = vmatpush1.bf16.msra.mxu0 %v856_v48 }
  0x73   :  { %484 = vmatprep.subr.bf16.mxu0 %v861_v49 }
  0x76   :  { %485 = vmatpush1.bf16.msra.mxu0 %v859_v50 }
  0x79   :  { %503 = vmatmul.mubr.bf16.vlgmr.msra.gmra.mrb[8].mxu0 %v821_v31  ;;  %v567_v31 = vld [vmem:[%s1060_s3] sm:$0x3]  ;;  %s968_s3 = smov [#allocation9]  }
  0x7a   :  { %512 = vmatprep.mubr.bf16.mxu0 %v967_v0  ;;  %v572_v33 = vrot.slane %v567_v31, %v571_v30  ;;  %v576_v34 = vrot.slane %v567_v31, %v575_v32  ;;  %s706_s28 = sshll.u32 %s968_s3, 4  ;;  %s707_s28 = int_to_ptr.vmem [resolvable:$true] %s706_s28 }
  0x7b   :  { %s932_s29 = scalar_lea.vmem %s707_s28, 2048  ;;  %p937_p11 = scmp.lt.s32.totalorder %s707_s28, %s707_s28 }
  0x7c   :  { %p933_p10 = scmp.ne.s32.totalorder %s707_s28, %s932_s29  ;;  %p938_p12 = scmp.lt.s32.totalorder %s932_s29, %s932_s29 }
  0x7e   :  { %p939_p13 = por %p938_p12, %p937_p11 }
  0x80   :  { %p940_p0 = pnand %p939_p13, %p933_p10 }
  0x81   :  { %513 = vmatmul.mubr.bf16.gmra.mrb[12].mxu0 %v846_v39 }
 0x12c   :  { %v398_v51 = vpop.f32.mrb[0].mxu0 }
 0x12d   :  { %v400_v52 = vpop.f32.mrb[1].mxu0 }
 0x12e   :  { %v402_v53 = vpop.f32.mrb[2].mxu0  ;;  %v451_v58 = vpop.f32.mrb[0].mxu1 }
 0x12f   :  { %v523_v54 = vpack.c.bf16 %v402_v53, %v398_v51  ;;  %v404_v55 = vpop.f32.mrb[3].mxu0  ;;  %v453_v60 = vpop.f32.mrb[1].mxu1 }
 0x130   :  { %v524_v56 = vpack.c.bf16 %v404_v55, %v400_v52  ;;  %v455_v62 = vpop.f32.mrb[2].mxu1 }
 0x131   :  { %v531_v2 = vpack.c.bf16 %v455_v62, %v451_v58  ;;  %v457_v3 = vpop.f32.mrb[3].mxu1 }
 0x132   :  { %612 = vmatprep.subr.bf16.mxu1 %v524_v56  ;;  %v532_v5 = vpack.c.bf16 %v457_v3, %v453_v60 }
 0x133   :  { %613 = vmatpush1.bf16.msra.mxu1 %v523_v54 }
 0x134   :  { %v408_v57 = vpop.f32.mrb[4].mxu0 }
 0x135   :  { %v410_v59 = vpop.f32.mrb[5].mxu0 }
 0x136   :  { %v412_v61 = vpop.f32.mrb[6].mxu0  ;;  %v461_v6 = vpop.f32.mrb[4].mxu1 }
 0x137   :  { %v525_v63 = vpack.c.bf16 %v412_v61, %v408_v57  ;;  %v414_v1 = vpop.f32.mrb[7].mxu0  ;;  %v463_v7 = vpop.f32.mrb[5].mxu1 }
 0x138   :  { %v526_v4 = vpack.c.bf16 %v414_v1, %v410_v59  ;;  %v465_v8 = vpop.f32.mrb[6].mxu1 }
 0x139   :  { %v533_v9 = vpack.c.bf16 %v465_v8, %v461_v6  ;;  %v467_v10 = vpop.f32.mrb[7].mxu1 }
 0x13a   :  { %614 = vmatprep.subr.bf16.mxu1 %v526_v4  ;;  %v534_v11 = vpack.c.bf16 %v467_v10, %v463_v7 }
 0x13b   :  { %615 = vmatpush1.bf16.msra.mxu1 %v525_v63 }
 0x13c   :  { %616 = vmatprep.subr.bf16.mxu1 %v532_v5 }
 0x13f   :  { %617 = vmatpush1.bf16.msra.mxu1 %v531_v2 }
 0x140   :  { %618 = vmatprep.subr.bf16.mxu1 %v534_v11 }
 0x143   :  { %619 = vmatpush1.bf16.msra.mxu1 %v533_v9 }
 0x14c   :  { %v504_v12 = vpop.f32.mrb[8].mxu0 }
 0x14d   :  { %v506_v13 = vpop.f32.mrb[9].mxu0 }
 0x14e   :  { %v508_v14 = vpop.f32.mrb[10].mxu0 }
 0x14f   :  { %v539_v15 = vpack.c.bf16 %v508_v14, %v504_v12  ;;  %v510_v16 = vpop.f32.mrb[11].mxu0 }
 0x150   :  { %v540_v17 = vpack.c.bf16 %v510_v16, %v506_v13 }
 0x152   :  { %620 = vmatprep.subr.bf16.mxu1 %v540_v17 }
 0x153   :  { %621 = vmatpush1.bf16.msra.mxu1 %v539_v15 }
 0x154   :  { %v514_v18 = vpop.f32.mrb[12].mxu0 }
 0x155   :  { %v516_v19 = vpop.f32.mrb[13].mxu0 }
 0x156   :  { %v518_v20 = vpop.f32.mrb[14].mxu0 }
 0x157   :  { %v541_v21 = vpack.c.bf16 %v518_v20, %v514_v18  ;;  %v520_v22 = vpop.f32.mrb[15].mxu0 }
 0x158   :  { %v542_v23 = vpack.c.bf16 %v520_v22, %v516_v19 }
 0x15a   :  { %622 = vmatprep.subr.bf16.mxu1 %v542_v23 }
 0x15b   :  { %623 = vmatpush1.bf16.msra.mxu1 %v541_v21 }
 0x15e   :  { %773 = vmatmul.mubr.msk.bf16.vlgmr.msra.gmra.mrb[8].mxu1 %vm599_vm0, %v862_v24 }
 0x15f   :  { %654 = vmatprep.mubr.bf16.mxu1 %v967_v0 }
 0x166   :  { %774 = vmatmul.mubr.msk.bf16.gmra.mrb[12].mxu1 %vm599_vm0, %v863_v25 }
 0x167   :  { %664 = vmatprep.mubr.bf16.mxu1 %v967_v0 }
 0x16e   :  { %775 = vmatmul.mubr.msk.bf16.gmra.mrb[16].mxu1 %vm599_vm0, %v864_v26 }
 0x16f   :  { %674 = vmatprep.mubr.bf16.mxu1 %v967_v0 }
 0x176   :  { %776 = vmatmul.mubr.msk.bf16.gmra.mrb[20].mxu1 %vm599_vm0, %v865_v27 }
 0x231   :  { %v646_v35 = vpop.f32.mrb[8].mxu1 }
 0x232   :  { %v647_v36 = vadd.f32 %v646_v35, %v572_v33  ;;  %v648_v37 = vpop.f32.mrb[9].mxu1 }
 0x233   :  { %v649_v38 = vadd.f32 %v648_v37, %v576_v34  ;;  %v650_v39 = vpop.f32.mrb[10].mxu1 }
 0x234   :  { %685 = vst [vmem:[#allocation9] sm:$0xff] %v647_v36  ;;  %v651_v40 = vadd.f32 %v650_v39, %v572_v33  ;;  %v652_v0 = vpop.f32.mrb[11].mxu1 }
 0x235   :  { %686 = vst [vmem:[#allocation9 + $0x8] sm:$0xff] %v649_v38  ;;  %v653_v41 = vadd.f32 %v652_v0, %v576_v34 }
 0x236   :  { %687 = vst [vmem:[#allocation9 + $0x10] sm:$0xff] %v651_v40 }
 0x237   :  { %688 = vst [vmem:[#allocation9 + $0x18] sm:$0xff] %v653_v41 }
 0x239   :  { %v656_v42 = vpop.f32.mrb[12].mxu1 }
 0x23a   :  { %v657_v43 = vadd.f32 %v656_v42, %v572_v33  ;;  %v658_v44 = vpop.f32.mrb[13].mxu1 }
 0x23b   :  { %v659_v45 = vadd.f32 %v658_v44, %v576_v34  ;;  %v660_v46 = vpop.f32.mrb[14].mxu1 }
 0x23c   :  { %689 = vst [vmem:[#allocation9 + $0x20] sm:$0xff] %v657_v43  ;;  %v661_v47 = vadd.f32 %v660_v46, %v572_v33  ;;  %v662_v48 = vpop.f32.mrb[15].mxu1 }
 0x23d   :  { %690 = vst [vmem:[#allocation9 + $0x28] sm:$0xff] %v659_v45  ;;  %v663_v49 = vadd.f32 %v662_v48, %v576_v34 }
 0x23e   :  { %691 = vst [vmem:[#allocation9 + $0x30] sm:$0xff] %v661_v47 }
 0x23f   :  { %692 = vst [vmem:[#allocation9 + $0x38] sm:$0xff] %v663_v49 }
 0x241   :  { %v666_v50 = vpop.f32.mrb[16].mxu1 }
 0x242   :  { %v667_v51 = vadd.f32 %v666_v50, %v572_v33  ;;  %v668_v52 = vpop.f32.mrb[17].mxu1 }
 0x243   :  { %v669_v53 = vadd.f32 %v668_v52, %v576_v34  ;;  %v670_v54 = vpop.f32.mrb[18].mxu1 }
 0x244   :  { %693 = vst [vmem:[#allocation9 + $0x40] sm:$0xff] %v667_v51  ;;  %v671_v55 = vadd.f32 %v670_v54, %v572_v33  ;;  %v672_v56 = vpop.f32.mrb[19].mxu1 }
 0x245   :  { %694 = vst [vmem:[#allocation9 + $0x48] sm:$0xff] %v669_v53  ;;  %v673_v57 = vadd.f32 %v672_v56, %v576_v34 }
 0x246   :  { %695 = vst [vmem:[#allocation9 + $0x50] sm:$0xff] %v671_v55 }
 0x247   :  { %696 = vst [vmem:[#allocation9 + $0x58] sm:$0xff] %v673_v57 }
 0x249   :  { %v676_v58 = vpop.f32.mrb[20].mxu1 }
 0x24a   :  { %v677_v59 = vadd.f32 %v676_v58, %v572_v33  ;;  %v678_v60 = vpop.f32.mrb[21].mxu1 }
 0x24b   :  { %v679_v61 = vadd.f32 %v678_v60, %v576_v34  ;;  %v680_v62 = vpop.f32.mrb[22].mxu1 }
 0x24c   :  { %697 = vst [vmem:[#allocation9 + $0x60] sm:$0xff] %v677_v59  ;;  %v681_v63 = vadd.f32 %v680_v62, %v572_v33  ;;  %v682_v1 = vpop.f32.mrb[23].mxu1 }
 0x24d   :  { %698 = vst [vmem:[#allocation9 + $0x68] sm:$0xff] %v679_v61  ;;  %v683_v2 = vadd.f32 %v682_v1, %v576_v34 }
 0x24e   :  { %699 = vst [vmem:[#allocation9 + $0x70] sm:$0xff] %v681_v63 }
 0x24f   :  { %700 = vst [vmem:[#allocation9 + $0x78] sm:$0xff] %v683_v2 }
 0x250   :  { %943 = shalt.err (!%p940_p0)
}
 0x251   :  { %s944_s6 = scalar_lea.hbm %s1061_s4, 2048 }
 0x252   :  { %p945_p1 = scmp.ne.s32.totalorder %s1061_s4, %s944_s6  ;;  %p948_p2 = scmp.lt.u32.totalorder %s944_s6, %s1061_s4 }
 0x254   :  { %p950_p3 = pnand %p948_p2, %p945_p1 }
 0x256   :  { %953 = shalt.err (!%p950_p3)
}
 0x257   :  { %s969_s11 = smov 256   ;;  %s970_s12 = smov 16  }
 0x258   :  { %712 = dma.vmem_to_hbm [thread:$0]  %s707_s28, 2048, %s1061_s4, [#allocation5], %s969_s11, %s969_s11, %s970_s12  }
 0x259   :  { %958 = dma.done.wait [#allocation5], 2048  }
 0x25a   :  { %959 = vsyncadd [#allocation5], 4294965248 }
 0x25b   :  { %716 = vsyncpa [#allocation4], 1 }
 0x25c   :  { %717 = vsyncpa [#allocation7], 1 }
 0x25d   :  { %718 = vsyncpa [#allocation5], 1 }

</bundles_post_ra>
